<compile_context>
chip_gen: v5e
topology: v5e:2x2
jax: 0.10.0
libtpu: 0.0.40
codegen_flags: <defaults>
</compile_context>

<pallas_src>
import functools

import jax
import jax.numpy as jnp
from jax.experimental import pallas as pl
from jax.experimental.pallas import tpu as pltpu

_LANES = 128
_SUBLANES = 8
_MAX_TILE_ROWS = 2048   # 1 MiB per f32 input block; 2 inputs x 2 buffers = 4 MiB
_NUM_CORE_SPLITS = 2    # v7x has 2 TensorCores; sequential (still correct) on v5e/v6e


def _focal_terms(x_raw, t_raw, alpha, gamma, logits):
    """Per-element focal loss in f32 (matches the PyTorch forward)."""
    x = x_raw.astype(jnp.float32)
    t = t_raw.astype(jnp.float32)
    if logits:
        # binary_cross_entropy_with_logits, numerically stable form.
        bce = jnp.maximum(x, 0.0) - x * t + jnp.log1p(jnp.exp(-jnp.abs(x)))
    else:
        # binary_cross_entropy: PyTorch clamps the log terms at -100.
        log_p = jnp.maximum(jnp.log(x), -100.0)
        log_1mp = jnp.maximum(jnp.log(1.0 - x), -100.0)
        bce = -(t * log_p + (1.0 - t) * log_1mp)
    pt = jnp.exp(-bce)
    one_minus_pt = 1.0 - pt
    g = float(gamma)
    if g == 2.0:                      # default: square, no pow -> exp(g*log(.)) on EUP
        mod = one_minus_pt * one_minus_pt
    elif g == int(g) and g >= 0:      # other small integer exponents: repeated multiply
        mod = jnp.ones_like(one_minus_pt)
        for _ in range(int(g)):
            mod = mod * one_minus_pt
    else:                             # general float gamma (clamp avoids NaN if pt > 1)
        mod = jnp.maximum(one_minus_pt, 0.0) ** g
    return float(alpha) * mod * bce


def _focal_sum_kernel(x_ref, t_ref, out_ref, *, alpha, gamma, logits,
                      n_valid, tile_rows, blocks_per_core):
    c = pl.program_id(0)   # core split (parallel)
    i = pl.program_id(1)   # row-block loop (arbitrary / reduction)

    @pl.when(i == 0)
    def _init():
        out_ref[...] = jnp.zeros_like(out_ref)

    f_loss = _focal_terms(x_ref[...], t_ref[...], alpha, gamma, logits)

    # Logical (unclamped) element offset of this block; phantom/tail blocks get
    # fully/partially masked. (int32 math: fine for < 2^31 total elements.)
    block_elems = tile_rows * _LANES
    block_start = (c * blocks_per_core + i) * block_elems

    def _partial(v):
        # Vreg-shaped partial sum: pure VPU adds, defer cross-lane reduce.
        return jnp.sum(v.reshape(tile_rows // _SUBLANES, _SUBLANES, _LANES), axis=0)

    @pl.when(block_start + block_elems <= n_valid)
    def _full_block():
        out_ref[...] += _partial(f_loss)

    @pl.when(block_start + block_elems > n_valid)
    def _tail_block():
        row_ids = jax.lax.broadcasted_iota(jnp.int32, (tile_rows, _LANES), 0)
        lane_ids = jax.lax.broadcasted_iota(jnp.int32, (tile_rows, _LANES), 1)
        elem = block_start + row_ids * _LANES + lane_ids
        out_ref[...] += _partial(jnp.where(elem < n_valid, f_loss, 0.0))


def _focal_elem_kernel(x_ref, t_ref, o_ref, *, alpha, gamma, logits):
    o_ref[...] = _focal_terms(x_ref[...], t_ref[...], alpha, gamma, logits
                              ).astype(o_ref.dtype)


def focal_loss(inputs, targets, alpha=1.0, gamma=2.0, logits=False, reduce=True):
    """Focal loss matching the PyTorch reference module."""
    n_valid = int(inputs.size)
    x = inputs.reshape(-1)
    t = targets.reshape(-1)

    # Only pad when the flat length is not a multiple of the 128-lane width
    # (needed to form the lane-dense 2D view; masked out in-kernel anyway).
    rem = n_valid % _LANES
    if rem:
        pad = _LANES - rem
        pad_x = 0.0 if logits else 0.5   # benign values (no log(0) garbage)
        x = jnp.pad(x, (0, pad), constant_values=pad_x)
        t = jnp.pad(t, (0, pad), constant_values=1)
    rows = x.size // _LANES
    x2 = x.reshape(rows, _LANES)
    t2 = t.reshape(rows, _LANES)

    tile_rows = max(_SUBLANES,
                    min(_MAX_TILE_ROWS, pl.cdiv(rows, _SUBLANES) * _SUBLANES))
    num_blocks = pl.cdiv(rows, tile_rows)

    if reduce:
        blocks_per_core = pl.cdiv(num_blocks, _NUM_CORE_SPLITS)

        def in_map(c, i):
            # Clamp the DMA to a real block; phantom blocks (odd num_blocks) are
            # fully masked inside the kernel via the unclamped element index.
            return (jnp.minimum(c * blocks_per_core + i, num_blocks - 1), 0)

        kernel = functools.partial(
            _focal_sum_kernel,
            alpha=float(alpha), gamma=float(gamma), logits=bool(logits),
            n_valid=n_valid, tile_rows=tile_rows, blocks_per_core=blocks_per_core)

        partials = pl.pallas_call(
            kernel,
            out_shape=jax.ShapeDtypeStruct(
                (_NUM_CORE_SPLITS * _SUBLANES, _LANES), jnp.float32),
            grid_spec=pltpu.PrefetchScalarGridSpec(
                num_scalar_prefetch=0,
                grid=(_NUM_CORE_SPLITS, blocks_per_core),
                in_specs=[
                    pl.BlockSpec((tile_rows, _LANES), in_map),
                    pl.BlockSpec((tile_rows, _LANES), in_map),
                ],
                out_specs=pl.BlockSpec((_SUBLANES, _LANES), lambda c, i: (c, 0)),
            ),
            compiler_params=pltpu.CompilerParams(
                dimension_semantics=("parallel", "arbitrary")),
        )(x2, t2)
        mean = jnp.sum(partials) / jnp.float32(n_valid)
        return mean.astype(inputs.dtype)

    # reduce=False: per-element focal loss, same shape/dtype as `inputs`.
    kernel = functools.partial(
        _focal_elem_kernel,
        alpha=float(alpha), gamma=float(gamma), logits=bool(logits))
    out2 = pl.pallas_call(
        kernel,
        out_shape=jax.ShapeDtypeStruct((rows, _LANES), inputs.dtype),
        grid_spec=pltpu.PrefetchScalarGridSpec(
            num_scalar_prefetch=0,
            grid=(num_blocks,),
            in_specs=[
                pl.BlockSpec((tile_rows, _LANES), lambda i: (i, 0)),
                pl.BlockSpec((tile_rows, _LANES), lambda i: (i, 0)),
            ],
            out_specs=pl.BlockSpec((tile_rows, _LANES), lambda i: (i, 0)),
        ),
        compiler_params=pltpu.CompilerParams(
            dimension_semantics=("parallel",)),
    )(x2, t2)
    return out2.reshape(-1)[:n_valid].reshape(inputs.shape)


def _reference_focal_loss_elem(inputs, targets, alpha=1.0, gamma=2.0, logits=False):
    x = inputs.astype(jnp.float32)
    t = targets.astype(jnp.float32)
    if logits:
        bce = jnp.maximum(x, 0.0) - x * t + jnp.log1p(jnp.exp(-jnp.abs(x)))
    else:
        bce = -(t * jnp.maximum(jnp.log(x), -100.0)
                + (1.0 - t) * jnp.maximum(jnp.log(1.0 - x), -100.0))
    pt = jnp.exp(-bce)
    return alpha * (1.0 - pt) ** gamma * bce


def _reference_focal_loss(inputs, targets, alpha=1.0, gamma=2.0, logits=False):
    return jnp.mean(_reference_focal_loss_elem(inputs, targets, alpha, gamma, logits))


if __name__ == "__main__":
    key = jax.random.PRNGKey(0)
    k1, k2 = jax.random.split(key)
    # NCHW probabilities in (0, 1) since logits=False by default.
    shape = (2, 4, 16, 16)
    inputs = jax.random.uniform(k1, shape, jnp.float32, minval=1e-4, maxval=1.0 - 1e-4)
    targets = (jax.random.uniform(k2, shape, jnp.float32) > 0.5).astype(jnp.float32)

    # Default module config: mean reduction.
    out = focal_loss(inputs, targets, alpha=1.0, gamma=2.0, logits=False, reduce=True)
    out = jax.block_until_ready(out)
    ref = _reference_focal_loss(inputs, targets)
    assert jnp.allclose(out, ref, rtol=1e-5, atol=1e-6), (out, ref)

    # Also check the non-reduced (per-element) path.
    out_elem = jax.block_until_ready(
        focal_loss(inputs, targets, alpha=1.0, gamma=2.0, logits=False, reduce=False))
    ref_elem = _reference_focal_loss_elem(inputs, targets)
    assert jnp.allclose(out_elem, ref_elem, rtol=1e-5, atol=1e-6)

    print("KERNEL_OK")
</pallas_src>

<mosaic_0001>
module attributes {stable_mosaic.version = 11 : i64} {
  func.func @_focal_sum_kernel(%arg0: i32, %arg1: i32, %arg2: memref<16x128xf32, #tpu.memory_space<vmem>>, %arg3: memref<16x128xf32, #tpu.memory_space<vmem>>, %arg4: memref<8x128xf32, #tpu.memory_space<vmem>>) attributes {dimension_semantics = [#tpu.dimension_semantics<parallel>, #tpu.dimension_semantics<arbitrary>], iteration_bounds = array<i64: 2, 1>, scalar_prefetch = 0 : i64, scratch_operands = 0 : i64, tpu.core_type = #tpu.core_type<tc>, window_params = [{transform_indices = @transform_0, window_bounds = array<i64: 16, 128>}, {transform_indices = @transform_1, window_bounds = array<i64: 16, 128>}, {transform_indices = @transform_2, window_bounds = array<i64: 8, 128>}]} {
    %c0_i32 = arith.constant 0 : i32
    %0 = arith.cmpi eq, %arg1, %c0_i32 : i32
    %1 = arith.extui %0 : i1 to i32
    %c0_i32_0 = arith.constant 0 : i32
    %2 = arith.cmpi ne, %1, %c0_i32_0 : i32
    scf.if %2 {
      %cst_17 = arith.constant 0.000000e+00 : f32
      %40 = vector.broadcast %cst_17 : f32 to vector<8x128xf32>
      %c0_18 = arith.constant 0 : index
      %c0_19 = arith.constant 0 : index
      %41 = vector.load %arg4[%c0_18, %c0_19] : memref<8x128xf32, #tpu.memory_space<vmem>>, vector<8x128xf32>
      tpu.vector_store %arg4[%c0_18, %c0_19], %40 {strides = array<i32>} : memref<8x128xf32, #tpu.memory_space<vmem>>, vector<8x128xf32>,
    } else {
    }
    %c0 = arith.constant 0 : index
    %c0_1 = arith.constant 0 : index
    %3 = vector.load %arg2[%c0, %c0_1] : memref<16x128xf32, #tpu.memory_space<vmem>>, vector<16x128xf32>
    %c0_2 = arith.constant 0 : index
    %c0_3 = arith.constant 0 : index
    %4 = vector.load %arg3[%c0_2, %c0_3] : memref<16x128xf32, #tpu.memory_space<vmem>>, vector<16x128xf32>
    %5 = math.log %3 : vector<16x128xf32>
    %cst = arith.constant -1.000000e+02 : f32
    %6 = vector.broadcast %cst : f32 to vector<16x128xf32>
    %7 = arith.maximumf %5, %6 : vector<16x128xf32>
    %cst_4 = arith.constant 1.000000e+00 : f32
    %8 = vector.broadcast %cst_4 : f32 to vector<16x128xf32>
    %9 = arith.subf %8, %3 : vector<16x128xf32>
    %10 = math.log %9 : vector<16x128xf32>
    %cst_5 = arith.constant -1.000000e+02 : f32
    %11 = vector.broadcast %cst_5 : f32 to vector<16x128xf32>
    %12 = arith.maximumf %10, %11 : vector<16x128xf32>
    %13 = arith.mulf %4, %7 : vector<16x128xf32>
    %cst_6 = arith.constant 1.000000e+00 : f32
    %14 = vector.broadcast %cst_6 : f32 to vector<16x128xf32>
    %15 = arith.subf %14, %4 : vector<16x128xf32>
    %16 = arith.mulf %15, %12 : vector<16x128xf32>
    %17 = arith.addf %13, %16 : vector<16x128xf32>
    %cst_7 = arith.constant 0.000000e+00 : f32
    %18 = vector.broadcast %cst_7 : f32 to vector<16x128xf32>
    %19 = arith.subf %18, %17 : vector<16x128xf32>
    %cst_8 = arith.constant 0.000000e+00 : f32
    %20 = vector.broadcast %cst_8 : f32 to vector<16x128xf32>
    %21 = arith.subf %20, %19 : vector<16x128xf32>
    %22 = math.exp %21 : vector<16x128xf32>
    %cst_9 = arith.constant 1.000000e+00 : f32
    %23 = vector.broadcast %cst_9 : f32 to vector<16x128xf32>
    %24 = arith.subf %23, %22 : vector<16x128xf32>
    %25 = arith.mulf %24, %24 : vector<16x128xf32>
    %cst_10 = arith.constant 1.000000e+00 : f32
    %26 = vector.broadcast %cst_10 : f32 to vector<16x128xf32>
    %27 = arith.mulf %26, %25 : vector<16x128xf32>
    %28 = arith.mulf %27, %19 : vector<16x128xf32>
    %c1_i32 = arith.constant 1 : i32
    %29 = arith.muli %arg0, %c1_i32 : i32
    %30 = arith.addi %29, %arg1 : i32
    %c2048_i32 = arith.constant 2048 : i32
    %31 = arith.muli %30, %c2048_i32 : i32
    %c2048_i32_11 = arith.constant 2048 : i32
    %32 = arith.addi %31, %c2048_i32_11 : i32
    %c2048_i32_12 = arith.constant 2048 : i32
    %33 = arith.cmpi sle, %32, %c2048_i32_12 : i32
    %34 = arith.extui %33 : i1 to i32
    %c0_i32_13 = arith.constant 0 : i32
    %35 = arith.cmpi ne, %34, %c0_i32_13 : i32
    scf.if %35 {
      %c0_17 = arith.constant 0 : index
      %c0_18 = arith.constant 0 : index
      %40 = vector.load %arg4[%c0_17, %c0_18] : memref<8x128xf32, #tpu.memory_space<vmem>>, vector<8x128xf32>
      %41 = vector.shape_cast %28 : vector<16x128xf32> to vector<2x8x128xf32>
      %cst_19 = arith.constant dense<0.000000e+00> : vector<8x128xf32>
      %42 = vector.multi_reduction <add>, %41, %cst_19 [0] : vector<2x8x128xf32> to vector<8x128xf32>
      %43 = arith.addf %40, %42 : vector<8x128xf32>
      %c0_20 = arith.constant 0 : index
      %c0_21 = arith.constant 0 : index
      %44 = vector.load %arg4[%c0_20, %c0_21] : memref<8x128xf32, #tpu.memory_space<vmem>>, vector<8x128xf32>
      tpu.vector_store %arg4[%c0_20, %c0_21], %43 {strides = array<i32>} : memref<8x128xf32, #tpu.memory_space<vmem>>, vector<8x128xf32>,
    } else {
    }
    %c2048_i32_14 = arith.constant 2048 : i32
    %36 = arith.addi %31, %c2048_i32_14 : i32
    %c2048_i32_15 = arith.constant 2048 : i32
    %37 = arith.cmpi sgt, %36, %c2048_i32_15 : i32
    %38 = arith.extui %37 : i1 to i32
    %c0_i32_16 = arith.constant 0 : i32
    %39 = arith.cmpi ne, %38, %c0_i32_16 : i32
    scf.if %39 {
      %40 = tpu.iota {dimensions = array<i32: 0>} : vector<16x128xi32>
      %41 = tpu.iota {dimensions = array<i32: 1>} : vector<16x128xi32>
      %c128_i32 = arith.constant 128 : i32
      %42 = vector.broadcast %c128_i32 : i32 to vector<16x128xi32>
      %43 = arith.muli %40, %42 : vector<16x128xi32>
      %44 = vector.broadcast %31 : i32 to vector<16x128xi32>
      %45 = arith.addi %44, %43 : vector<16x128xi32>
      %46 = arith.addi %45, %41 : vector<16x128xi32>
      %c0_17 = arith.constant 0 : index
      %c0_18 = arith.constant 0 : index
      %47 = vector.load %arg4[%c0_17, %c0_18] : memref<8x128xf32, #tpu.memory_space<vmem>>, vector<8x128xf32>
      %c2048_i32_19 = arith.constant 2048 : i32
      %48 = vector.broadcast %c2048_i32_19 : i32 to vector<16x128xi32>
      %49 = arith.cmpi slt, %46, %48 : vector<16x128xi32>
      %cst_20 = arith.constant 0.000000e+00 : f32
      %50 = vector.broadcast %cst_20 : f32 to vector<16x128xf32>
      %51 = arith.select %49, %28, %50 : vector<16x128xi1>, vector<16x128xf32>
      %52 = vector.shape_cast %51 : vector<16x128xf32> to vector<2x8x128xf32>
      %cst_21 = arith.constant dense<0.000000e+00> : vector<8x128xf32>
      %53 = vector.multi_reduction <add>, %52, %cst_21 [0] : vector<2x8x128xf32> to vector<8x128xf32>
      %54 = arith.addf %47, %53 : vector<8x128xf32>
      %c0_22 = arith.constant 0 : index
      %c0_23 = arith.constant 0 : index
      %55 = vector.load %arg4[%c0_22, %c0_23] : memref<8x128xf32, #tpu.memory_space<vmem>>, vector<8x128xf32>
      tpu.vector_store %arg4[%c0_22, %c0_23], %54 {strides = array<i32>} : memref<8x128xf32, #tpu.memory_space<vmem>>, vector<8x128xf32>,
    } else {
    }
    return
  }
  func.func @transform_0(%arg0: i32, %arg1: i32) -> (i32, i32) {
    %c1_i32 = arith.constant 1 : i32
    %0 = arith.muli %arg0, %c1_i32 : i32
    %1 = arith.addi %0, %arg1 : i32
    %c0_i32 = arith.constant 0 : i32
    %2 = arith.minsi %1, %c0_i32 : i32
    %c0_i32_0 = arith.constant 0 : i32
    %c0_i32_1 = arith.constant 0 : i32
    return %2, %c0_i32_0 : i32, i32
  }
  func.func @transform_1(%arg0: i32, %arg1: i32) -> (i32, i32) {
    %c1_i32 = arith.constant 1 : i32
    %0 = arith.muli %arg0, %c1_i32 : i32
    %1 = arith.addi %0, %arg1 : i32
    %c0_i32 = arith.constant 0 : i32
    %2 = arith.minsi %1, %c0_i32 : i32
    %c0_i32_0 = arith.constant 0 : i32
    %c0_i32_1 = arith.constant 0 : i32
    return %2, %c0_i32_0 : i32, i32
  }
  func.func @transform_2(%arg0: i32, %arg1: i32) -> (i32, i32) {
    %c0_i32 = arith.constant 0 : i32
    %c0_i32_0 = arith.constant 0 : i32
    return %arg0, %c0_i32 : i32, i32
  }
}

</mosaic_0001>

<bundles_post_ra>
// kernel: tpu_custom_call.1
= control target key start
LH: loop header
LB: loop body
LE: loop exit
PB: predicated region body
PF: predicated region fallthrough
CT: control target
= control target key end

     0   :  { %7 = vsyncpa [#allocation3], 0  ;;  %s948_s0 = inlined_call_operand.hbm [shape: f32[16,128], index: 0, kind: input, shape index: {}]   ;;  %s949_s1 = inlined_call_operand.hbm [shape: f32[16,128], index: 1, kind: input, shape index: {}]   ;;  %s950_s2 = inlined_call_operand.hbm [shape: f32[16,128], index: 2, kind: output, shape index: {}]  }
   0x1   :  { %9 = vsyncpa [#allocation3 + $0x1], 0 }
   0x2   :  { %10 = vsyncpa [#allocation6], 0 }
   0x3   :  { %12 = vsyncpa [#allocation6 + $0x1], 0 }
   0x4   :  { %13 = vsyncpa [#allocation4], 0 }
   0x5   :  { %15 = vsyncpa [#allocation4 + $0x1], 0  ;;  %s759_s9 = smov 0   ;;  %s761_s10 = smov 0  }
   0x6   :  { %s763_s11 = smov 0   ;;  %s765_s12 = smov 0  }
   0x7   :  { %s767_s13 = smov 0   ;;  %s769_s14 = smov 0  }
   0x8   :  { %s771_s15 = smov 0   ;;  %s773_s16 = smov 0  }
   0x9 LB: > { %s441_s17 = sadd.s32 4294967295, %s737_s16   ;;  %s442_s18 = sadd.s32 4294967294, %s737_s16   ;;  %s737_s16 = sphi %s773_s16, %s21_s16   ;;  %s733_s15 = sphi %s771_s15, %s962_s15   ;;  %s729_s14 = sphi %s769_s14, %s961_s14   ;;  %s725_s13 = sphi %s767_s13, %s938_s13   ;;  %s721_s12 = sphi %s765_s12, %s960_s12   ;;  %s717_s11 = sphi %s763_s11, %s959_s11   ;;  %s713_s10 = sphi %s761_s10, %s958_s10   ;;  %s709_s9 = sphi %s759_s9, %s957_s9  }
   0xa   : > { %s33_s19 = sadd.s32 1, %s733_s15  ;;  %p706_p1 = scmp.ne.s32.totalorder %s725_s13, 0 }
   0xb   : > { %p35_p0 = scmp.ge.s32.totalorder %s33_s19, 2  ;;  %p54_p2 = scmp.eq.s32.totalorder %s737_s16, 0 }
   0xc   : > { %p59_p3 = scmp.ne.s32.totalorder %s725_s13, %s721_s12  ;;  %p60_p5 = scmp.eq.s32.totalorder %s441_s17, 0 }
   0xd   : > { %s964_s19 = smov (%p35_p0, %s33_s19), 0  ;;  %p805_p4 = por %p706_p1, %p54_p2 }
   0xe   : > { %p809_p6 = por %p60_p5, %p59_p3  ;;  %s101_s22 = ssub.s32 %s733_s15, %s964_s19 }
   0xf   : > { %p102_p7 = scmp.eq.s32.totalorder %s101_s22, 0  ;;  %s104_s23 = sadd.s32 1, %s717_s11 }
  0x10   : > { %p114_p8 = scmp.ne.s32.totalorder %s717_s11, %s713_s10  ;;  %p115_p9 = scmp.eq.s32.totalorder %s441_s17, 1 }
  0x11   : > { %s817_s24 = scalar_select %p102_p7, %s717_s11, %s104_s23  }
  0x12   : > { %p120_p10 = scmp.ne.s32.totalorder %s713_s10, %s709_s9  ;;  %p121_p11 = scmp.eq.s32.totalorder %s442_s18, 1 }
  0x13   : > { %p823_p12 = por %p115_p9, %p114_p8  ;;  %p444_p13 = scmp.ge.s32.totalorder %s737_s16, 2 }
  0x14   : > { %p828_p0 = por %p121_p11, %p120_p10  ;;  %p481_p1 = scmp.lt.s32.totalorder %s737_s16, 2 }
  0x15   : > { %s154_s29 = sshll.u32 %s948_s0, 4  ;;  %s739_s30 = smov [#allocation2]   ;;  %s155_s29 = int_to_ptr.hbm [resolvable:$true] %s154_s29 }
  0x16   : > { %s156_s3 = sshll.u32 %s739_s30, 4  ;;  %p838_p2 = pnand %p481_p1, %p805_p4  ;;  %s157_s3 = int_to_ptr.vmem [resolvable:$true] %s156_s3 }
  0x17   : > { %p451_p3 = scmp.ge.s32.totalorder %s737_s16, 1  ;;  %p189_p5 = scmp.lt.s32.totalorder %s737_s16, 3 }
  0x18   : > { %s570_s5 = sshra.s32 %s155_s29, 4  ;;  %p574_p8 = pneg %p838_p2  ;;  %s571_s5 = int_to_ptr.hbm [resolvable:$true] %s570_s5 }
  0x19   : > { %s572_s6 = scalar_lea.hbm %s571_s5, 16  ;;  %s577_s12 = scalar_lea.hbm %s948_s0, 16 }
  0x1a   : > { %p573_p7 = scmp.ne.s32.totalorder %s571_s5, %s572_s6  ;;  %p579_p4 = scmp.lt.s32.totalorder %s577_s12, %s572_s6 }
  0x1c   : > { %p575_p9 = pnand %p574_p8, %p573_p7 }
  0x1e   : > { %p576_p10 = pneg %p575_p9 }
  0x20   : > { %p581_p11 = pnand %p579_p4, %p576_p10 }
  0x22   : > { %584 = shalt.err (!%p581_p11)
}
  0x23   : > { %s740_s17 = smov 128   ;;  %s741_s18 = smov 8  }
  0x24   : > { %473 = dma.hbm_to_vmem [thread:$0]  (!%p838_p2), %s155_s29, 256, %s157_s3, [#allocation3], %s740_s17, %s740_s17, %s741_s18  }
  0x25   : > { %p858_p1 = pnand %p451_p3, %p189_p5  ;;  %s179_s27 = sshll.u32 %s949_s1, 4  ;;  %s180_s27 = int_to_ptr.hbm [resolvable:$true] %s179_s27 }
  0x26   : > { %s742_s28 = smov [#allocation5]   ;;  %s600_s5 = sshra.s32 %s180_s27, 4  ;;  %s601_s5 = int_to_ptr.hbm [resolvable:$true] %s600_s5 }
  0x27   : > { %s181_s30 = sshll.u32 %s742_s28, 4  ;;  %s602_s6 = scalar_lea.hbm %s601_s5, 16  ;;  %s182_s30 = int_to_ptr.vmem [resolvable:$true] %s181_s30 }
  0x28   : > { %p603_p7 = scmp.ne.s32.totalorder %s601_s5, %s602_s6  ;;  %s607_s7 = scalar_lea.hbm %s949_s1, 16 }
  0x29   : > { %p609_p3 = scmp.lt.s32.totalorder %s607_s7, %s602_s6 }
  0x2a   : > { %p605_p9 = pnand %p603_p7, %p574_p8 }
  0x2c   : > { %p606_p10 = pneg %p605_p9 }
  0x2e   : > { %p611_p5 = pnand %p609_p3, %p606_p10 }
  0x30   : > { %614 = shalt.err (!%p611_p5)
}
  0x31   : > { %476 = dma.hbm_to_vmem [thread:$0]  (!%p838_p2), %s180_s27, 256, %s182_s30, [#allocation6], %s740_s17, %s740_s17, %s741_s18  }
  0x32   : > { %193 = sbr.rel (%p858_p1) target bundleno = 142 (0x8e), region = 28  ;;  %s195_s8 = sand.u32 (!%p858_p1), 1, %s725_s13  }
  0x33   : > { %s452_s12 = sshll.u32 (!%p858_p1), %s195_s8, 4  ;;  %s196_s22 = scalar_lea.sflag (!%p858_p1), [#allocation3], %s195_s8 }
  0x34   : > { %s199_s23 = scalar_lea.vmem (!%p858_p1), [#allocation2], %s452_s12 }
  0x37   : > { %695 = dma.done.wait (%p809_p6), %s196_s22, 256  }
  0x38   : > { %697 = vsyncadd (%p809_p6), %s196_s22, 4294967040  ;;  %s206_s28 = scalar_lea.sflag [#allocation6], %s195_s8  ;;  %s209_s5 = scalar_lea.vmem [#allocation5], %s452_s12 }
  0x39   : > { %699 = dma.done.wait (%p809_p6), %s206_s28, 256  }
  0x3a   : > { %701 = vsyncadd (%p809_p6), %s206_s28, 4294967040  ;;  %s455_s4 = sshll.u32 %s729_s14, 11  ;;  %s233_s18 = sand.u32 1, %s713_s10   ;;  %v249_v0 = vld [vmem:[%s199_s23] sm:$0xff]  ;;  %v250_v1 = vld [vmem:[%s199_s23 + $0x8] sm:$0xff]  ;;  %v743_v4 = vmov 0.0  }
  0x3b   : > { %s887_s17 = sadd.s32 2048, %s455_s4  ;;  %s454_s20 = sshll.u32 %s233_s18, 3  ;;  %558 = vlog2.f32 %v249_v0  ;;  %v259_v2 = vsub.f32 1.0, %v249_v0  ;;  %v260_v3 = vsub.f32 1.0, %v250_v1  ;;  %v251_v6 = vld [vmem:[%s209_s5] sm:$0xff]  ;;  %v252_v8 = vld [vmem:[%s209_s5 + $0x8] sm:$0xff] }
  0x3c   : > { %560 = vlog2.f32 %v250_v1  ;;  %s892_s21 = scalar_lea.vmem [#allocation7], %s454_s20  ;;  %v269_v15 = vsub.f32 1.0, %v251_v6  ;;  %v270_v18 = vsub.f32 1.0, %v252_v8  ;;  %p456_p6 = scmp.gt.s32.totalorder %s887_s17, 2048 }
  0x3d   : > { %562 = vlog2.f32 %v259_v2  ;;  %248 = vst [vmem:[%s892_s21] sm:$0xff] %v743_v4 }
  0x3e   : > { %564 = vlog2.f32 %v260_v3 }
  0x41   : > { %v559_v5 = vpop.eup %558 }
  0x42   : > { %v561_v7 = vpop.eup %560  ;;  %v254_v9 = vmul.f32 0.6931472, %v559_v5 }
  0x43   : > { %v563_v10 = vpop.eup %562  ;;  %v256_v11 = vmul.f32 0.6931472, %v561_v7 }
  0x44   : > { %v565_v12 = vpop.eup %564  ;;  %v257_v13 = vmax.f32 %v254_v9, -100.0  ;;  %v262_v14 = vmul.f32 0.6931472, %v563_v10 }
  0x45   : > { %v258_v16 = vmax.f32 %v256_v11, -100.0  ;;  %v264_v17 = vmul.f32 0.6931472, %v565_v12 }
  0x46   : > { %v265_v19 = vmax.f32 %v262_v14, -100.0  ;;  %v267_v20 = vmul.f32 %v257_v13, %v251_v6 }
  0x47   : > { %v266_v21 = vmax.f32 %v264_v17, -100.0  ;;  %v268_v22 = vmul.f32 %v258_v16, %v252_v8 }
  0x48   : > { %v271_v23 = vmul.f32 %v269_v15, %v265_v19 }
  0x49   : > { %v272_v24 = vmul.f32 %v270_v18, %v266_v21 }
  0x4a   : > { %v273_v25 = vadd.f32 %v271_v23, %v267_v20 }
  0x4b   : > { %v274_v26 = vadd.f32 %v272_v24, %v268_v22 }
  0x4c   : > { %v275_v27 = vsub.f32 0.0, %v273_v25 }
  0x4d   : > { %v276_v28 = vsub.f32 0.0, %v274_v26 }
  0x4e   : > { %v277_v29 = vsub.f32 0.0, %v275_v27 }
  0x4f   : > { %v278_v30 = vsub.f32 0.0, %v276_v28 }
  0x50   : > { %v279_v31 = vmul.f32 1.442695, %v277_v29 }
  0x51   : > { %v281_v32 = vmul.f32 1.442695, %v278_v30 }
  0x52   : > { %566 = vpow2.f32 %v279_v31 }
  0x53   : > { %568 = vpow2.f32 %v281_v32 }
  0x58   : > { %v567_v33 = vpop.eup %566 }
  0x59   : > { %v569_v34 = vpop.eup %568  ;;  %v283_v35 = vsub.f32 1.0, %v567_v33 }
  0x5a   : > { %v284_v36 = vsub.f32 1.0, %v569_v34  ;;  %295 = sbr.rel (%p456_p6) target bundleno = 101 (0x65), region = 44 }
  0x5b   : > { %v285_v37 = vmul.f32 %v283_v35, %v283_v35 }
  0x5c   : > { %v286_v38 = vmul.f32 %v284_v36, %v284_v36 }
  0x5d   : > { %v287_v39 = vmul.f32 %v285_v37, %v275_v27 }
  0x5e   : > { %v288_v40 = vmul.f32 %v286_v38, %v276_v28 }
  0x5f   : > { %v296_v41 = vld [vmem:[%s892_s21] sm:$0xff] }
  0x60   : > { %v297_v42 = vadd.f32 %v288_v40, %v287_v39 }
  0x62   : > { %v298_v43 = vadd.f32 %v297_v42, %v296_v41 }
  0x64   : > { %299 = vst [vmem:[%s892_s21] sm:$0xff] %v298_v43 }
  0x65 PF: > { %p457_p2 = scmp.le.s32.totalorder %s887_s17, 2048 }
  0x67   : > { %303 = sbr.rel (%p457_p2) target bundleno = 127 (0x7f), region = 48 }
  0x6c   : > { %v304_v44 = vlaneseq  ;;  %v311_v46 = vstv %s455_s4  ;;  %v316_v56 = vld [vmem:[%s892_s21] sm:$0xff] }
  0x6e   : > { %v305_v45 = vshrl.u32 %v304_v44, 7  ;;  %v308_v48 = vand.u32 127, %v304_v44 }
  0x70   : > { %v306_v47 = vadd.s32 8, %v305_v45  ;;  %v309_v49 = vmul.u32 128, %v305_v45 }
  0x72   : > { %v310_v50 = vmul.u32 128, %v306_v47  ;;  %v312_v51 = vadd.s32 %v311_v46, %v309_v49 }
  0x74   : > { %v313_v52 = vadd.s32 %v311_v46, %v310_v50  ;;  %v314_v53 = vadd.s32 %v312_v51, %v308_v48 }
  0x76   : > { %v315_v54 = vadd.s32 %v313_v52, %v308_v48  ;;  %vm317_vm0 = vcmp.lt.s32.totalorder %v314_v53, 2048 }
  0x77   : > { %v319_v55 = vsel %vm317_vm0, %v287_v39, 0.0 }
  0x78   : > { %vm318_vm1 = vcmp.lt.s32.totalorder %v315_v54, 2048 }
  0x79   : > { %v320_v57 = vsel %vm318_vm1, %v288_v40, 0.0 }
  0x7a   : > { %v321_v58 = vadd.f32 %v320_v57, %v319_v55 }
  0x7c   : > { %v322_v59 = vadd.f32 %v321_v58, %v316_v56 }
  0x7e   : > { %323 = vst [vmem:[%s892_s21] sm:$0xff] %v322_v59 }
  0x7f PF: > { %s459_s27 = sshll.u32 %s729_s14, 3  ;;  %s337_s3 = sshll.u32 %s892_s21, 4  ;;  %s338_s3 = int_to_ptr.vmem [resolvable:$true] %s337_s3 }
  0x80   : > { %s335_s29 = scalar_lea.hbm %s950_s2, %s459_s27  ;;  %s325_s8 = scalar_lea.sflag [#allocation4], %s233_s18 }
  0x81   : > { %s339_s7 = sshll.u32 %s335_s29, 4  ;;  %s650_s14 = scalar_lea.hbm %s950_s2, 16  ;;  %s340_s7 = int_to_ptr.hbm [resolvable:$true] %s339_s7 }
  0x82   : > { %s644_s12 = sshra.s32 %s340_s7, 4  ;;  %s645_s12 = int_to_ptr.hbm [resolvable:$true] %s644_s12 }
  0x83   : > { %s646_s22 = scalar_lea.hbm %s645_s12, 8  ;;  %p651_p1 = scmp.lt.s32.totalorder %s645_s12, %s950_s2 }
  0x84   : > { %p647_p8 = scmp.ne.s32.totalorder %s645_s12, %s646_s22  ;;  %p652_p7 = scmp.lt.s32.totalorder %s650_s14, %s646_s22 }
  0x86   : > { %p648_p4 = pnand %p647_p8, %p823_p12  ;;  %p653_p9 = por %p652_p7, %p651_p1 }
  0x88   : > { %p649_p11 = pneg %p648_p4 }
  0x8a   : > { %p654_p10 = pnand %p653_p9, %p649_p11 }
  0x8c   : > { %657 = shalt.err (!%p654_p10)
}
  0x8d   : > { %468 = dma.vmem_to_hbm [thread:$0]  (%p823_p12), %s338_s3, 128, %s340_s7, %s325_s8  }
  0x8e PF: > { %s351_s17 = sand.u32 1, %s709_s9   ;;  %p478_p3 = pnand %p444_p13, %p828_p0 }
  0x8f   : > { %s352_s18 = scalar_lea.sflag [#allocation4], %s351_s17 }
  0x90   : > { %p479_p5 = pneg %p478_p3 }
  0x92   : > { %703 = dma.done.wait (%p479_p5), %s352_s18, 128  }
  0x93   : > { %705 = vsyncadd (%p479_p5), %s352_s18, 4294967168  ;;  %s21_s16 = sadd.s32 1, %s737_s16   ;;  %s957_s9 = smov %s713_s10 }
  0x94   : > { %p18_p6 = scmp.ge.s32.totalorder %s21_s16, 4   ;;  %s958_s10 = smov %s717_s11 }
  0x95   : > { %s959_s11 = smov %s817_s24  ;;  %s960_s12 = smov %s725_s13 }
  0x96   : > { %s938_s13 = smov 0   ;;  %s961_s14 = smov %s733_s15 }
  0x97   : > { %s962_s15 = smov %s964_s19  ;;  %20 = sbr.rel (!%p18_p6) target bundleno = 9 (0x9), region = 98 }
  0x9c   :  { %358 = vsyncpa [#allocation3], 1 }
  0x9d   :  { %360 = vsyncpa [#allocation3 + $0x1], 1 }
  0x9e   :  { %361 = vsyncpa [#allocation6], 1 }
  0x9f   :  { %363 = vsyncpa [#allocation6 + $0x1], 1 }
  0xa0   :  { %364 = vsyncpa [#allocation4], 1 }
  0xa1   :  { %366 = vsyncpa [#allocation4 + $0x1], 1 }

</bundles_post_ra>
